<compile_context>
chip_gen: v5e
topology: v5e:2x2
jax: 0.10.0
libtpu: 0.0.40
codegen_flags: <defaults>
</compile_context>

<pallas_src>
import jax
import jax.numpy as jnp
from jax import lax
from jax.experimental import pallas as pl
from jax.experimental.pallas import tpu as pltpu

N_EMBD = 64
TILE_M_DEFAULT = 1024  # ~256 KiB of f32 x-tile per buffer; well inside VMEM on v5e/v6e/v7x


def _newhead_kernel(x_ref, w_ref, b_ref, o_ref):
    # x_ref: (TILE_M, n_embd)   w_ref: (1, n_embd)   b_ref: (1,) in SMEM
    # o_ref: (1, TILE_M)  -- lane-dense output (M on the lane axis)
    y = lax.dot_general(
        w_ref[...], x_ref[...],
        dimension_numbers=(((1,), (1,)), ((), ())),   # contract n_embd dims -> (1, TILE_M)
        preferred_element_type=jnp.float32,
    )
    o_ref[...] = jax.nn.sigmoid(y + b_ref[0]).astype(o_ref.dtype)


def new_head_forward(x, w, b):
    """x: (..., n_embd); w: (1, n_embd) (PyTorch layout); b: (1,)."""
    orig_shape = x.shape
    n_embd = orig_shape[-1]
    m = 1
    for d in orig_shape[:-1]:
        m *= d

    x2d = x.reshape(m, n_embd)
    w_row = w.reshape(1, n_embd)          # keep PyTorch row layout; contract inside kernel
    b1 = b.reshape(1).astype(jnp.float32)  # SMEM scalar

    # Tile size over M: 1024 rows for large M, else round M up to a sublane multiple.
    tile_m = TILE_M_DEFAULT
    if m < tile_m:
        tile_m = max(8, ((m + 7) // 8) * 8)

    # Pad rows to a multiple of 8 so the x tile's sublane dim is always clean.
    m_pad = ((m + 7) // 8) * 8
    if m_pad != m:
        x2d = jnp.pad(x2d, ((0, m_pad - m), (0, 0)))

    grid = (pl.cdiv(m_pad, tile_m),)

    out_row = pl.pallas_call(
        _newhead_kernel,
        out_shape=jax.ShapeDtypeStruct((1, m_pad), x.dtype),
        grid=grid,
        in_specs=[
            pl.BlockSpec((tile_m, n_embd), lambda i: (i, 0)),   # streamed x tiles
            pl.BlockSpec((1, n_embd), lambda i: (0, 0)),        # resident weight row
            pl.BlockSpec(memory_space=pltpu.SMEM),              # bias scalar
        ],
        out_specs=pl.BlockSpec((1, tile_m), lambda i: (0, i)),  # lane-dense output
        compiler_params=pltpu.CompilerParams(
            dimension_semantics=("parallel",),
        ),
        cost_estimate=pl.CostEstimate(
            flops=2 * m * n_embd,
            transcendentals=m,
            bytes_accessed=4 * (m * n_embd + m + n_embd + 1),
        ),
    )(x2d, w_row, b1)

    # (1, m_pad) -> (..., 1); same memory order, so this is just a relabeling.
    return out_row[0, :m].reshape(orig_shape[:-1] + (1,))


def _init_params(key, n_embd):
    # Deterministic init matching nn.Linear default: U(-1/sqrt(fan_in), 1/sqrt(fan_in))
    kw, kb = jax.random.split(key)
    bound = 1.0 / jnp.sqrt(jnp.float32(n_embd))
    w = jax.random.uniform(kw, (1, n_embd), jnp.float32, -bound, bound)
    b = jax.random.uniform(kb, (1,), jnp.float32, -bound, bound)
    return w, b


if __name__ == "__main__":
    key = jax.random.PRNGKey(0)
    kx, kp = jax.random.split(key)

    batch, seq = 2, 8
    x = jax.random.normal(kx, (batch, seq, N_EMBD), jnp.float32)
    w, b = _init_params(kp, N_EMBD)

    out = new_head_forward(x, w, b)
    jax.block_until_ready(out)

    # Reference check against plain JAX
    ref = jax.nn.sigmoid(x @ w.T + b)
    assert out.shape == (batch, seq, 1), out.shape
    assert jnp.allclose(out, ref, atol=1e-5, rtol=1e-5), "mismatch vs reference"

    print("KERNEL_OK")
</pallas_src>

<mosaic_0001>
module attributes {stable_mosaic.version = 11 : i64} {
  func.func @_newhead_kernel(%arg0: i32, %arg1: memref<16x64xf32, #tpu.memory_space<vmem>>, %arg2: memref<1x64xf32, #tpu.memory_space<vmem>>, %arg3: memref<1xf32, #tpu.memory_space<smem>>, %arg4: memref<1x16xf32, #tpu.memory_space<vmem>>) attributes {dimension_semantics = [#tpu.dimension_semantics<parallel>], iteration_bounds = array<i64: 1>, scalar_prefetch = 0 : i64, scratch_operands = 0 : i64, tpu.core_type = #tpu.core_type<tc>, window_params = [{transform_indices = @transform_0, window_bounds = array<i64: 16, 64>}, {pipeline_mode = #tpu.pipeline_mode<synchronous>, transform_indices = @transform_1, window_bounds = array<i64: 1, 64>}, {transform_indices = @transform_2, window_bounds = array<i64: 1>}, {transform_indices = @transform_3, window_bounds = array<i64: 1, 16>}]} {
    %c0 = arith.constant 0 : index
    %c0_0 = arith.constant 0 : index
    %0 = vector.load %arg2[%c0, %c0_0] : memref<1x64xf32, #tpu.memory_space<vmem>>, vector<1x64xf32>
    %c0_1 = arith.constant 0 : index
    %c0_2 = arith.constant 0 : index
    %1 = vector.load %arg1[%c0_1, %c0_2] : memref<16x64xf32, #tpu.memory_space<vmem>>, vector<16x64xf32>
    %cst = arith.constant dense<0.000000e+00> : vector<1x16xf32>
    %2 = tpu.matmul %0, %1, %cst {dimension_numbers = #tpu.dot_dimension_numbers<[1], [1], [0], [0], [0, 0, 1, 0], [], []>} : vector<1x64xf32>, vector<16x64xf32>, vector<1x16xf32> -> vector<1x16xf32>
    %c0_3 = arith.constant 0 : index
    %3 = memref.load %arg3[%c0_3] : memref<1xf32, #tpu.memory_space<smem>>
    %4 = vector.broadcast %3 : f32 to vector<1x16xf32>
    %5 = arith.addf %2, %4 : vector<1x16xf32>
    %6 = arith.negf %5 : vector<1x16xf32>
    %7 = math.exp %6 : vector<1x16xf32>
    %cst_4 = arith.constant 1.000000e+00 : f32
    %8 = vector.broadcast %cst_4 : f32 to vector<1x16xf32>
    %9 = arith.addf %8, %7 : vector<1x16xf32>
    %10 = arith.divf %8, %9 : vector<1x16xf32>
    %c0_5 = arith.constant 0 : index
    %c0_6 = arith.constant 0 : index
    %11 = vector.load %arg4[%c0_5, %c0_6] : memref<1x16xf32, #tpu.memory_space<vmem>>, vector<1x16xf32>
    tpu.vector_store %arg4[%c0_5, %c0_6], %10 {strides = array<i32>} : memref<1x16xf32, #tpu.memory_space<vmem>>, vector<1x16xf32>,
    return
  }
  func.func @transform_0(%arg0: i32) -> (i32, i32) {
    %c0_i32 = arith.constant 0 : i32
    %c0_i32_0 = arith.constant 0 : i32
    return %arg0, %c0_i32 : i32, i32
  }
  func.func @transform_1(%arg0: i32) -> (i32, i32) {
    %c0_i32 = arith.constant 0 : i32
    %c0_i32_0 = arith.constant 0 : i32
    %c0_i32_1 = arith.constant 0 : i32
    return %c0_i32, %c0_i32_0 : i32, i32
  }
  func.func @transform_2(%arg0: i32) -> i32 {
    %c0_i32 = arith.constant 0 : i32
    %c0_i32_0 = arith.constant 0 : i32
    return %c0_i32 : i32
  }
  func.func @transform_3(%arg0: i32) -> (i32, i32) {
    %c0_i32 = arith.constant 0 : i32
    %c0_i32_0 = arith.constant 0 : i32
    return %c0_i32, %arg0 : i32, i32
  }
}

</mosaic_0001>

<bundles_post_ra>
// kernel: tpu_custom_call.1
= control target key start
LH: loop header
LB: loop body
LE: loop exit
PB: predicated region body
PF: predicated region fallthrough
CT: control target
= control target key end

     0   :  { %9 = vsyncpa [#allocation4], 0  ;;  %s205_s0 = inlined_call_operand.hbm [shape: f32[16,64], index: 0, kind: input, shape index: {}]   ;;  %s206_s1 = inlined_call_operand.vmem [shape: f32[1,64], index: 1, kind: input, shape index: {}]   ;;  %s207_s2 = inlined_call_operand.<no memory space> [shape: f32[1], index: 2, kind: input, shape index: {}]   ;;  %s208_s3 = inlined_call_operand.hbm [shape: f32[1,16], index: 3, kind: output, shape index: {}]  }
   0x1   :  { %10 = vsyncpa [#allocation5], 0  ;;  %s15_s14 = sshll.u32 %s205_s0, 4  ;;  %s169_s15 = smov [#allocation3]   ;;  %s16_s14 = int_to_ptr.hbm [resolvable:$true] %s15_s14 }
   0x2   :  { %s17_s16 = sshll.u32 %s169_s15, 4  ;;  %s170_s17 = smov 128   ;;  %s18_s16 = int_to_ptr.vmem [resolvable:$true] %s17_s16 }
   0x3   :  { %s171_s18 = smov 8  }
   0x4   :  { %23 = dma.hbm_to_vmem [thread:$0]  %s16_s14, 256, %s18_s16, [#allocation4], %s170_s17, %s170_s17, %s171_s18  }
   0x5   :  { %165 = dma.done.wait [#allocation4], 256  }
   0x6   :  { %166 = vsyncadd [#allocation4], 4294967040  ;;  %vm37_vm0 = vcmask 523264   ;;  %v34_v0 = vld [vmem:[#allocation3 + $0x8] sm:$0xff]  ;;  %v33_v1 = vld [vmem:[#allocation3] sm:$0xff]  ;;  %v36_v3 = vstv %s207_s2  ;;  %s95_s2 = sshll.u32 %s208_s3, 4  ;;  %s96_s2 = int_to_ptr.hbm [resolvable:$true] %s95_s2 }
   0x7   :  { %105 = vmatpush.xpose.msk.msra.mxu0 %vm37_vm0, %v34_v0  ;;  %v32_v2 = vld [vmem:[%s206_s1] sm:$0x1]  ;;  %s172_s1 = smov [#allocation6]   ;;  %vm86_vm4 = vcmask 122880  }
   0x8   :  { %s93_s22 = sshll.u32 %s172_s1, 4  ;;  %s94_s22 = int_to_ptr.vmem [resolvable:$true] %s93_s22 }
   0xb   :  { %106 = vmatpush.xpose.msk.msra.mxu0 %vm37_vm0, %v33_v1 }
   0xe   :  { %107 = vmatmul.msk.f32.vlgmr.msra.gmra.mxu0 %vm37_vm0, %v32_v2 }
  0x8b   :  { %v64_v4 = vpop.f32.mrf.mxu0 }
  0x8c   :  { %v65_v5 = vadd.f32 %v64_v4, %v36_v3 }
  0x8e   :  { %v108_v6 = vmul.f32 -1.442695, %v65_v5 }
  0x90   :  { %113 = vpow2.f32 %v108_v6 }
  0x96   :  { %v114_v7 = vpop.eup %113 }
  0x97   :  { %v70_v8 = vadd.f32 1.0, %v114_v7 }
  0x99   :  { %115 = vrcp.f32 %v70_v8  ;;  %v82_v12 = vand.u32 2147483648, %v70_v8  ;;  %v80_v14 = vand.u32 2147483647, %v70_v8  ;;  %vm76_vm2 = vweird.f32 %v70_v8 }
  0x9b   :  { %v83_v16 = vor.u32 1.1754944e-38, %v82_v12  ;;  %vm81_vm5 = vcmp.eq.f32.partialorder %v80_v14, 8.507059e+37 }
  0x9f   :  { %v116_v9 = vpop.eup %115 }
  0xa0   :  { %v72_v10 = vmul.f32 %v116_v9, %v70_v8  ;;  %vm77_vm1 = vweird.f32 %v116_v9 }
  0xa1   :  { %vm78_vm3 = vmor %vm76_vm2, %vm77_vm1 }
  0xa2   :  { %v73_v11 = vsub.f32 1.0, %v72_v10 }
  0xa4   :  { %v74_v13 = vmul.f32 %v116_v9, %v73_v11 }
  0xa6   :  { %v75_v15 = vadd.f32 %v116_v9, %v74_v13 }
  0xa8   :  { %v79_v17 = vsel %vm78_vm3, %v116_v9, %v75_v15 }
  0xa9   :  { %v84_v18 = vsel %vm81_vm5, %v83_v16, %v79_v17 }
  0xaa   :  { %87 = vst.msk [vmem:[#allocation6] sm:$0x1] %vm86_vm4, %v84_v18 }
  0xab   :  { %98 = dma.vmem_to_hbm [thread:$0]  %s94_s22, 16, %s96_s2, [#allocation5]  }
  0xac   :  { %167 = dma.done.wait [#allocation5], 16  }
  0xad   :  { %168 = vsyncadd [#allocation5], 4294967280 }
  0xae   :  { %103 = vsyncpa [#allocation4], 1 }
  0xaf   :  { %104 = vsyncpa [#allocation5], 1 }

</bundles_post_ra>
